<compile_context>
chip_gen: v7x
topology: tpu7x:2x2x1
jax: 0.10.0
libtpu: 0.0.40
codegen_flags: <defaults>
</compile_context>

<pallas_src>
import math
import re

import jax
import jax.numpy as jnp
from jax.experimental import pallas as pl
from jax.experimental.pallas import tpu as pltpu

_LANES = 128
_EXPANSION = 2
_GROUP_CHANNELS = (32, 64, 128, 256, 512)


def _round_up(x, m):
    return (x + m - 1) // m * m


def _tpu_generation():
    try:
        kind = jax.devices()[0].device_kind.lower()
        m = re.search(r"v(\d+)", kind)
        return int(m.group(1)) if m else 0
    except Exception:
        return 0


_GEN = _tpu_generation()
_MAX_TILE_M = 512 if _GEN == 6 else 256                       # v6e: big M tiles
_VMEM_LIMIT = (100 if _GEN in (5, 6) else 48) * 1024 * 1024   # v7x: 64 MiB physical

# (di, dj, pi, pj) sub-taps of the 2x2 space-to-depth decomposition of a 3x3/s2
# conv -- only the 9 structurally non-zero ones (i = 2*di+pi < 3, j = 2*dj+pj < 3).
_S2_TAPS = [(di, dj, pi, pj)
            for di in range(2) for dj in range(2)
            for pi in range(2) for pj in range(2)
            if 2 * di + pi < 3 and 2 * dj + pj < 3]
_S2_SLAB_TAPS = ((0, 0), (0, 1), (1, 0), (1, 1))


# ----------------------------------------------------------------------------
# Pallas kernel: sum of tap matmuls (bf16 x bf16 -> f32, local accumulator)
# + BN affine + LeakyReLU(0.1) [+ fused bf16 residual], bf16 store.
# ----------------------------------------------------------------------------
def _make_kernel(row_offs, ch_offs, k_tap, k_total, tile_m, has_res):
    n_taps = len(row_offs)
    full_k = (k_tap == k_total)

    def kernel(x_ref, w_ref, s_ref, b_ref, *rest):
        if has_res:
            r_ref, o_ref = rest
        else:
            (o_ref,) = rest
        base = pl.multiple_of(pl.program_id(2) * tile_m, tile_m)
        acc = None
        for t in range(n_taps):
            row0 = base + row_offs[t]
            if full_k:
                xs = x_ref[pl.ds(row0, tile_m), :]
            else:
                xs = x_ref[pl.ds(row0, tile_m), pl.ds(ch_offs[t], k_tap)]
            part = jnp.dot(xs, w_ref[t], preferred_element_type=jnp.float32)
            acc = part if acc is None else acc + part
        y = acc * s_ref[...] + b_ref[...]          # eval-mode BN affine, in f32
        y = jnp.where(y >= 0.0, y, 0.1 * y)        # LeakyReLU(0.1) (module spec)
        if has_res:
            y = y + r_ref[...].astype(jnp.float32)
        o_ref[...] = y.astype(o_ref.dtype)         # bf16 writeback

    return kernel


def _run_conv(xflat, prep, row_offs, ch_offs, k_tap, tile_m, m_out_pad,
              residual_flat=None):
    n, m_in, k_total = xflat.shape
    wt, scale, bias = prep["wt"], prep["scale"], prep["bias"]
    n_taps, _, co_pad = wt.shape
    tile_co = _LANES
    has_res = residual_flat is not None

    in_specs = [
        # Full flat image stays VMEM-resident across the (cout, M) sweep.
        pl.BlockSpec((None, m_in, k_total), lambda b, c, m: (b, 0, 0)),
        pl.BlockSpec((n_taps, k_tap, tile_co), lambda b, c, m: (0, 0, c)),
        pl.BlockSpec((1, tile_co), lambda b, c, m: (0, c)),
        pl.BlockSpec((1, tile_co), lambda b, c, m: (0, c)),
    ]
    args = [xflat, wt, scale, bias]
    if has_res:
        in_specs.append(pl.BlockSpec((None, tile_m, tile_co),
                                     lambda b, c, m: (b, m, c)))
        args.append(residual_flat)

    return pl.pallas_call(
        _make_kernel(tuple(row_offs), tuple(ch_offs), k_tap, k_total, tile_m,
                     has_res),
        out_shape=jax.ShapeDtypeStruct((n, m_out_pad, co_pad), jnp.bfloat16),
        grid=(n, co_pad // tile_co, m_out_pad // tile_m),
        in_specs=in_specs,
        out_specs=pl.BlockSpec((None, tile_m, tile_co), lambda b, c, m: (b, m, c)),
        compiler_params=pltpu.CompilerParams(
            dimension_semantics=("parallel", "parallel", "parallel"),
            vmem_limit_bytes=_VMEM_LIMIT),
    )(*args)


def _plan_tiles(m_out):
    if m_out <= 128:
        tile_m = max(8, _round_up(m_out, 8))
    elif m_out >= 8 * _MAX_TILE_M:
        tile_m = _MAX_TILE_M
    elif m_out >= 2048:
        tile_m = 256
    else:
        tile_m = 128
    return tile_m, _round_up(m_out, tile_m)


# ----------------------------------------------------------------------------
# One fused conv layer.  Activations are carried between layers as
#   {"x": bf16 (n, h, w, Cp) with Cp = round_up(valid_channels, 128), "c": valid}.
# ----------------------------------------------------------------------------
def conv_bn_lrelu(act, prep, kind, cout, residual=None):
    x, c = act["x"], act["c"]
    n, h, w, cp = x.shape
    wt = prep["wt"]
    co_pad = wt.shape[2]
    assert co_pad == _round_up(cout, _LANES)

    if kind == "s2":                       # 3x3 stride-2 via 2x2 space-to-depth
        n_taps, k_tap = wt.shape[0], wt.shape[1]
        c_p = k_tap if n_taps == 9 else k_tap // 4
        assert c_p == _round_up(c, 8)
        ho, wo = (h - 1) // 2 + 1, (w - 1) // 2 + 1
        wpe = _round_up(w + 2, 2)
        wimg = wpe // 2
        m_out = ho * wimg
        tile_m, m_out_pad = _plan_tiles(m_out)
        off_max = wimg + 1
        himg_ext = -(-(m_out_pad + off_max) // wimg)
        xp = jnp.pad(x[..., :c],
                     ((0, 0), (1, 2 * himg_ext - h - 1),
                      (1, wpe - w - 1), (0, c_p - c)))
        xflat = xp.reshape(n, himg_ext, 2, wimg, 2, c_p)
        xflat = xflat.transpose(0, 1, 3, 2, 4, 5).reshape(n, himg_ext * wimg,
                                                          4 * c_p)
        if n_taps == 9:                    # deep downsample: zero rows trimmed
            row_offs = [di * wimg + dj for (di, dj, pi, pj) in _S2_TAPS]
            ch_offs = [(2 * pi + pj) * c_p for (di, dj, pi, pj) in _S2_TAPS]
        else:                              # narrow downsample: zero-padded slabs
            row_offs = [di * wimg + dj for (di, dj) in _S2_SLAB_TAPS]
            ch_offs = [0] * 4
    elif kind == "3x3":
        assert wt.shape[0] == 9 and wt.shape[1] == cp
        k_tap = cp
        ho, wo = h, w
        wimg = _round_up(w + 2, 8)         # sublane-aligned i*wimg offsets ...
        if (wimg - (w + 2)) * 8 > (w + 2):  # ... unless it inflates tiny maps
            wimg = w + 2
        m_out = ho * wimg
        tile_m, m_out_pad = _plan_tiles(m_out)
        off_max = 2 * wimg + 2
        himg_ext = -(-(m_out_pad + off_max) // wimg)
        xp = jnp.pad(x, ((0, 0), (1, himg_ext - h - 1), (1, wimg - w - 1), (0, 0)))
        xflat = xp.reshape(n, himg_ext * wimg, cp)
        row_offs = [i * wimg + j for i in range(3) for j in range(3)]
        ch_offs = [0] * 9
    elif kind == "1x1":
        assert wt.shape[0] == 1 and wt.shape[1] == cp
        k_tap = cp
        ho, wo, wimg = h, w, w
        m_out = h * w
        tile_m, m_out_pad = _plan_tiles(m_out)
        himg_ext = -(-m_out_pad // w)
        xp = jnp.pad(x, ((0, 0), (0, himg_ext - h), (0, 0), (0, 0)))
        xflat = xp.reshape(n, himg_ext * w, cp)
        row_offs, ch_offs = [0], [0]
    else:
        raise ValueError(kind)

    res_flat = None
    if residual is not None:               # residual stays bf16 (perf review)
        rx = residual["x"]
        assert rx.shape == (n, ho, wo, co_pad)
        r = jnp.pad(rx, ((0, 0), (0, 0), (0, wimg - wo), (0, 0)))
        r = r.reshape(n, ho * wimg, co_pad)
        res_flat = jnp.pad(r, ((0, 0), (0, m_out_pad - ho * wimg), (0, 0)))

    out = _run_conv(xflat, prep, row_offs, ch_offs, k_tap, tile_m, m_out_pad,
                    res_flat)
    out = out[:, :ho * wimg, :].reshape(n, ho, wimg, co_pad)
    if wimg != wo:
        out = out[:, :, :wo, :]
    return {"x": out, "c": cout}


def preconv_apply(x_nhwc, prep, cout=32):
    """3x3/s1 conv on a 3-channel input: fold the 9 taps into the contraction dim
    (K = 27 -> 32) -- a tiny host im2col instead of nine K=8 matmuls."""
    n, h, w, cin = x_nhwc.shape
    xb = x_nhwc.astype(jnp.bfloat16)
    xp = jnp.pad(xb, ((0, 0), (1, 1), (1, 1), (0, 0)))
    patch = jnp.concatenate(
        [xp[:, i:i + h, j:j + w, :] for i in range(3) for j in range(3)], axis=-1)
    k_p = prep["wt"].shape[1]
    patch = jnp.pad(patch, ((0, 0), (0, 0), (0, 0), (0, k_p - 9 * cin)))
    return conv_bn_lrelu({"x": patch, "c": 9 * cin}, prep, kind="1x1", cout=cout)


# ----------------------------------------------------------------------------
# Parameters: raw init (mirrors DarkNetBackbone shapes) + one-time kernel packing.
# ----------------------------------------------------------------------------
def _init_conv_bn(key, kh, kw, cin, cout):
    k1, k2, k3, k4, k5 = jax.random.split(key, 5)
    fan_in = kh * kw * cin
    w = jax.random.normal(k1, (kh, kw, cin, cout), jnp.float32) / math.sqrt(fan_in)
    gamma = 1.0 + 0.1 * jax.random.normal(k2, (cout,), jnp.float32)
    beta = 0.1 * jax.random.normal(k3, (cout,), jnp.float32)
    rmean = 0.1 * jax.random.normal(k4, (cout,), jnp.float32)
    rvar = jnp.abs(jax.random.normal(k5, (cout,), jnp.float32)) + 0.5
    eps = 1e-5
    scale = gamma / jnp.sqrt(rvar + eps)
    bias = beta - rmean * scale
    return {"w": w, "scale": scale, "bias": bias}


def init_darknet_params(key, layers=(1, 2, 8, 8, 4)):
    key, sub = jax.random.split(key)
    params = {"preconv": _init_conv_bn(sub, 3, 3, 3, 32), "layers": []}
    in_ch = 32
    for channels, num_blocks in zip(_GROUP_CHANNELS, layers):
        key, sub = jax.random.split(key)
        lp = {"down": _init_conv_bn(sub, 3, 3, in_ch, channels * _EXPANSION),
              "blocks": []}
        in_ch = channels * _EXPANSION
        for _ in range(num_blocks):
            key, k1 = jax.random.split(key)
            key, k2 = jax.random.split(key)
            lp["blocks"].append({
                "conv1": _init_conv_bn(k1, 1, 1, in_ch, channels),
                "conv2": _init_conv_bn(k2, 3, 3, channels, channels * _EXPANSION),
            })
        params["layers"].append(lp)
    return params


def _prep_affine(p, cout, co_pad):
    s = jnp.pad(p["scale"].reshape(1, cout), ((0, 0), (0, co_pad - cout)))
    b = jnp.pad(p["bias"].reshape(1, cout), ((0, 0), (0, co_pad - cout)))
    return s.astype(jnp.float32), b.astype(jnp.float32)


def _prep_s1(p):
    kh, kw, cin, cout = p["w"].shape
    co_pad = _round_up(cout, _LANES)
    k_in = _round_up(cin, _LANES)          # carried activations are 128-padded
    wt = p["w"].reshape(kh * kw, cin, cout)
    wt = jnp.pad(wt, ((0, 0), (0, k_in - cin),
                      (0, co_pad - cout))).astype(jnp.bfloat16)
    s, b = _prep_affine(p, cout, co_pad)
    return {"wt": wt, "scale": s, "bias": b}


def _prep_preconv(p):
    kh, kw, cin, cout = p["w"].shape
    co_pad = _round_up(cout, _LANES)
    k = kh * kw * cin
    k_p = _round_up(k, 8)
    wt = p["w"].reshape(1, k, cout)
    wt = jnp.pad(wt, ((0, 0), (0, k_p - k),
                      (0, co_pad - cout))).astype(jnp.bfloat16)
    s, b = _prep_affine(p, cout, co_pad)
    return {"wt": wt, "scale": s, "bias": b}


def _prep_s2(p):
    _, _, cin, cout = p["w"].shape
    co_pad = _round_up(cout, _LANES)
    c_p = _round_up(cin, 8)
    wf = p["w"]
    if c_p % _LANES == 0:
        # Deep downsample: only the 9 structurally non-zero sub-tap slabs.
        wt = jnp.stack([wf[2 * di + pi, 2 * dj + pj]
                        for (di, dj, pi, pj) in _S2_TAPS], axis=0)
        wt = jnp.pad(wt, ((0, 0), (0, c_p - cin), (0, co_pad - cout)))
    else:
        # Narrow downsample: 4 taps over the 4*c_p phase channels (zero rows).
        slabs = []
        for di, dj in _S2_SLAB_TAPS:
            rows = []
            for pi in range(2):
                for pj in range(2):
                    i, j = 2 * di + pi, 2 * dj + pj
                    blk = wf[i, j] if (i < 3 and j < 3) else jnp.zeros(
                        (cin, cout), wf.dtype)
                    rows.append(jnp.pad(blk, ((0, c_p - cin), (0, 0))))
            slabs.append(jnp.concatenate(rows, axis=0))
        wt = jnp.pad(jnp.stack(slabs, axis=0), ((0, 0), (0, 0),
                                                (0, co_pad - cout)))
    s, b = _prep_affine(p, cout, co_pad)
    return {"wt": wt.astype(jnp.bfloat16), "scale": s, "bias": b}


def prepare_params(raw):
    """One-time packing of weights/affine into kernel-ready (bf16, padded) layout."""
    prep = {"preconv": _prep_preconv(raw["preconv"]), "layers": []}
    for lp in raw["layers"]:
        prep["layers"].append({
            "down": _prep_s2(lp["down"]),
            "blocks": [{"conv1": _prep_s1(b["conv1"]),
                        "conv2": _prep_s1(b["conv2"])} for b in lp["blocks"]],
        })
    return prep


# ----------------------------------------------------------------------------
# Forward pass: returns a tuple of per-group conv-outs, NCHW like PyTorch.
# ----------------------------------------------------------------------------
def darknet_backbone_forward(x_nchw, prep_params):
    x = jnp.transpose(x_nchw, (0, 2, 3, 1)).astype(jnp.float32)    # NCHW -> NHWC
    act = preconv_apply(x, prep_params["preconv"], cout=32)
    outs = []
    for lp, channels in zip(prep_params["layers"], _GROUP_CHANNELS):
        cexp = channels * _EXPANSION
        act = conv_bn_lrelu(act, lp["down"], kind="s2", cout=cexp)
        for blk in lp["blocks"]:
            y = conv_bn_lrelu(act, blk["conv1"], kind="1x1", cout=channels)
            act = conv_bn_lrelu(y, blk["conv2"], kind="3x3", cout=cexp,
                                residual=act)
        outs.append(jnp.transpose(act["x"][..., :act["c"]],
                                  (0, 3, 1, 2)).astype(jnp.float32))
    return tuple(outs)


# ----------------------------------------------------------------------------
# Pure-JAX reference (f32) for self-validation of each kernel configuration.
# ----------------------------------------------------------------------------
def _conv_bn_lrelu_ref(x, p, stride, residual=None):
    kh = p["w"].shape[0]
    pad = (kh - 1) // 2
    y = jax.lax.conv_general_dilated(
        x, p["w"], window_strides=(stride, stride),
        padding=((pad, pad), (pad, pad)),
        dimension_numbers=("NHWC", "HWIO", "NHWC"))
    y = y * p["scale"].reshape(1, 1, 1, -1) + p["bias"].reshape(1, 1, 1, -1)
    y = jnp.where(y >= 0, y, 0.1 * y)
    if residual is not None:
        y = y + residual
    return y


if __name__ == "__main__":
    key = jax.random.PRNGKey(0)
    pkey, xkey = jax.random.split(key)
    raw = init_darknet_params(pkey)
    prep = prepare_params(raw)
    ks = jax.random.split(xkey, 8)

    def carried(x_f32):
        c = x_f32.shape[-1]
        cp = _round_up(c, _LANES)
        xb = jnp.pad(x_f32, ((0, 0), (0, 0), (0, 0),
                             (0, cp - c))).astype(jnp.bfloat16)
        return {"x": xb, "c": c}

    def check(name, got_bf16, ref):
        got = got_bf16.astype(jnp.float32)
        assert got.shape == ref.shape, (name, got.shape, ref.shape)
        err = float(jnp.max(jnp.abs(got - ref)) / (jnp.max(jnp.abs(ref)) + 1e-6))
        assert err < 3e-2, (name, err)     # bf16-matmul / f32-accumulate tolerance

    # --- validate each kernel configuration class against the JAX reference ---
    x0 = jax.random.normal(ks[0], (2, 16, 16, 3), jnp.float32)
    g = preconv_apply(x0, prep["preconv"], cout=32)
    check("preconv_im2col", g["x"][..., :32],
          _conv_bn_lrelu_ref(x0, raw["preconv"], 1))

    x1 = jax.random.normal(ks[1], (2, 16, 16, 32), jnp.float32)
    g = conv_bn_lrelu(carried(x1), prep["layers"][0]["down"], kind="s2", cout=64)
    check("down_s2_slab", g["x"][..., :64],
          _conv_bn_lrelu_ref(x1, raw["layers"][0]["down"], 2))

    x2 = jax.random.normal(ks[2], (2, 8, 8, 64), jnp.float32)
    g = conv_bn_lrelu(carried(x2), prep["layers"][0]["blocks"][0]["conv1"],
                      kind="1x1", cout=32)
    check("conv1x1", g["x"][..., :32],
          _conv_bn_lrelu_ref(x2, raw["layers"][0]["blocks"][0]["conv1"], 1))

    x3 = jax.random.normal(ks[3], (2, 8, 8, 32), jnp.float32)
    r3 = jax.random.normal(ks[4], (2, 8, 8, 64), jnp.float32)
    g = conv_bn_lrelu(carried(x3), prep["layers"][0]["blocks"][0]["conv2"],
                      kind="3x3", cout=64, residual=carried(r3))
    check("conv3x3_res", g["x"][..., :64],
          _conv_bn_lrelu_ref(x3, raw["layers"][0]["blocks"][0]["conv2"], 1, r3))

    x4 = jax.random.normal(ks[5], (2, 1, 1, 512), jnp.float32)
    g = conv_bn_lrelu(carried(x4), prep["layers"][4]["down"], kind="s2", cout=1024)
    check("down_s2_trimmed", g["x"][..., :1024],
          _conv_bn_lrelu_ref(x4, raw["layers"][4]["down"], 2))

    # --- full backbone forward on the small example input (NCHW like PyTorch) ---
    x = jax.random.normal(ks[6], (2, 3, 16, 16), dtype=jnp.float32)
    fwd = jax.jit(darknet_backbone_forward)
    outs = fwd(x, prep)
    for o in outs:
        jax.block_until_ready(o)

    expected_shapes = [(2, 64, 8, 8), (2, 128, 4, 4), (2, 256, 2, 2),
                       (2, 512, 1, 1), (2, 1024, 1, 1)]
    assert len(outs) == 5
    for o, s in zip(outs, expected_shapes):
        assert o.shape == s, (o.shape, s)
        assert bool(jnp.all(jnp.isfinite(o)))

    print("KERNEL_OK")
</pallas_src>

<mosaic_0001>
module attributes {stable_mosaic.version = 11 : i64} {
  func.func @kernel(%arg0: i32, %arg1: i32, %arg2: i32, %arg3: memref<1x256x32xbf16, #tpu.memory_space<vmem>>, %arg4: memref<1x32x128xbf16, #tpu.memory_space<vmem>>, %arg5: memref<1x128xf32, #tpu.memory_space<vmem>>, %arg6: memref<1x128xf32, #tpu.memory_space<vmem>>, %arg7: memref<1x128x128xbf16, #tpu.memory_space<vmem>>) attributes {dimension_semantics = [#tpu.dimension_semantics<parallel>, #tpu.dimension_semantics<parallel>, #tpu.dimension_semantics<parallel>], iteration_bounds = array<i64: 2, 1, 2>, scalar_prefetch = 0 : i64, scratch_operands = 0 : i64, tpu.core_type = #tpu.core_type<tc>, window_params = [{transform_indices = @transform_0, window_bounds = array<i64: 1, 256, 32>}, {transform_indices = @transform_1, window_bounds = array<i64: 1, 32, 128>}, {transform_indices = @transform_2, window_bounds = array<i64: 1, 128>}, {transform_indices = @transform_3, window_bounds = array<i64: 1, 128>}, {transform_indices = @transform_4, window_bounds = array<i64: 1, 128, 128>}]} {
    %c128_i32 = arith.constant 128 : i32
    %0 = arith.muli %arg2, %c128_i32 : i32
    %1 = tpu.assume_multiple %0, 128 : i32
    %c0_i32 = arith.constant 0 : i32
    %2 = arith.addi %1, %c0_i32 : i32
    %c0 = arith.constant 0 : index
    %3 = arith.index_cast %2 : i32 to index
    %c0_0 = arith.constant 0 : index
    %4 = vector.load %arg3[%c0, %3, %c0_0] : memref<1x256x32xbf16, #tpu.memory_space<vmem>>, vector<1x128x32xbf16>
    %5 = vector.shape_cast %4 : vector<1x128x32xbf16> to vector<128x32xbf16>
    %c0_1 = arith.constant 0 : index
    %c0_2 = arith.constant 0 : index
    %c0_3 = arith.constant 0 : index
    %6 = vector.load %arg4[%c0_1, %c0_2, %c0_3] : memref<1x32x128xbf16, #tpu.memory_space<vmem>>, vector<1x32x128xbf16>
    %7 = vector.shape_cast %6 : vector<1x32x128xbf16> to vector<32x128xbf16>
    %cst = arith.constant dense<0.000000e+00> : vector<128x128xf32>
    %8 = tpu.matmul %5, %7, %cst {dimension_numbers = #tpu.dot_dimension_numbers<[1], [0], [0], [1], [0, 0, 1, 1], [], []>} : vector<128x32xbf16>, vector<32x128xbf16>, vector<128x128xf32> -> vector<128x128xf32>
    %c0_4 = arith.constant 0 : index
    %c0_5 = arith.constant 0 : index
    %9 = vector.load %arg5[%c0_4, %c0_5] : memref<1x128xf32, #tpu.memory_space<vmem>>, vector<1x128xf32>
    %10 = vector.broadcast %9 : vector<1x128xf32> to vector<128x128xf32>
    %11 = arith.mulf %8, %10 : vector<128x128xf32>
    %c0_6 = arith.constant 0 : index
    %c0_7 = arith.constant 0 : index
    %12 = vector.load %arg6[%c0_6, %c0_7] : memref<1x128xf32, #tpu.memory_space<vmem>>, vector<1x128xf32>
    %13 = vector.broadcast %12 : vector<1x128xf32> to vector<128x128xf32>
    %14 = arith.addf %11, %13 : vector<128x128xf32>
    %cst_8 = arith.constant 0.000000e+00 : f32
    %15 = vector.broadcast %cst_8 : f32 to vector<128x128xf32>
    %16 = arith.cmpf oge, %14, %15 : vector<128x128xf32>
    %cst_9 = arith.constant 1.000000e-01 : f32
    %17 = vector.broadcast %cst_9 : f32 to vector<128x128xf32>
    %18 = arith.mulf %17, %14 : vector<128x128xf32>
    %19 = arith.select %16, %14, %18 : vector<128x128xi1>, vector<128x128xf32>
    %20 = arith.truncf %19 : vector<128x128xf32> to vector<128x128xbf16>
    %c0_10 = arith.constant 0 : index
    %c0_11 = arith.constant 0 : index
    %c0_12 = arith.constant 0 : index
    %21 = vector.load %arg7[%c0_10, %c0_11, %c0_12] : memref<1x128x128xbf16, #tpu.memory_space<vmem>>, vector<1x128x128xbf16>
    %22 = vector.shape_cast %21 : vector<1x128x128xbf16> to vector<128x128xbf16>
    %23 = vector.shape_cast %20 : vector<128x128xbf16> to vector<1x128x128xbf16>
    tpu.vector_store %arg7[%c0_10, %c0_11, %c0_12], %23 {strides = array<i32>} : memref<1x128x128xbf16, #tpu.memory_space<vmem>>, vector<1x128x128xbf16>,
    return
  }
  func.func @transform_0(%arg0: i32, %arg1: i32, %arg2: i32) -> (i32, i32, i32) {
    %c0_i32 = arith.constant 0 : i32
    %c0_i32_0 = arith.constant 0 : i32
    %c0_i32_1 = arith.constant 0 : i32
    return %arg0, %c0_i32, %c0_i32_0 : i32, i32, i32
  }
  func.func @transform_1(%arg0: i32, %arg1: i32, %arg2: i32) -> (i32, i32, i32) {
    %c0_i32 = arith.constant 0 : i32
    %c0_i32_0 = arith.constant 0 : i32
    %c0_i32_1 = arith.constant 0 : i32
    return %c0_i32, %c0_i32_0, %arg1 : i32, i32, i32
  }
  func.func @transform_2(%arg0: i32, %arg1: i32, %arg2: i32) -> (i32, i32) {
    %c0_i32 = arith.constant 0 : i32
    %c0_i32_0 = arith.constant 0 : i32
    return %c0_i32, %arg1 : i32, i32
  }
  func.func @transform_3(%arg0: i32, %arg1: i32, %arg2: i32) -> (i32, i32) {
    %c0_i32 = arith.constant 0 : i32
    %c0_i32_0 = arith.constant 0 : i32
    return %c0_i32, %arg1 : i32, i32
  }
  func.func @transform_4(%arg0: i32, %arg1: i32, %arg2: i32) -> (i32, i32, i32) {
    %c0_i32 = arith.constant 0 : i32
    return %arg0, %arg2, %arg1 : i32, i32, i32
  }
}

</mosaic_0001>

<bundles_post_ra>
// kernel: tpu_custom_call.1
= control target key start
LH: loop header
LB: loop body
LE: loop exit
PB: predicated region body
PF: predicated region fallthrough
CT: control target
= control target key end

     0   :  { %9 = vsyncpa [#allocation3], 0  ;;  %s1351_s0 = inlined_call_operand.vmem [shape: bf16[2,256,32], index: 0, kind: input, shape index: {}]   ;;  %s1352_s1 = inlined_call_operand.vmem [shape: bf16[1,32,128], index: 1, kind: input, shape index: {}]   ;;  %s1353_s2 = inlined_call_operand.vmem [shape: f32[1,128], index: 2, kind: input, shape index: {}]   ;;  %s1354_s3 = inlined_call_operand.vmem [shape: f32[1,128], index: 3, kind: input, shape index: {}]   ;;  %s1355_s4 = inlined_call_operand.hbm [shape: bf16[2,256,128], index: 4, kind: output, shape index: {}]  }
   0x1   :  { %11 = vsyncpa [#allocation3 + $0x1], 0  ;;  %s1137_s15 = smov 0   ;;  %s1139_s16 = smov 0  }
   0x2   :  { %s1141_s17 = smov 0   ;;  %s1143_s18 = smov 0  }
   0x3   :  { %s1145_s19 = smov 0   ;;  %s1147_s20 = smov 0  }
   0x4   :  { %s1149_s21 = smov 0   ;;  %s1151_s22 = smov 0  }
   0x5 LB: > { %s777_s23 = sadd.s32 4294967295, %s1107_s22   ;;  %s778_s24 = sadd.s32 4294967294, %s1107_s22   ;;  %s1107_s22 = sphi %s1151_s22, %s17_s22   ;;  %s1103_s21 = sphi %s1149_s21, %s1364_s21   ;;  %s1099_s20 = sphi %s1147_s20, %s1363_s20   ;;  %s1095_s19 = sphi %s1145_s19, %s1362_s19   ;;  %s1091_s18 = sphi %s1143_s18, %s1361_s18   ;;  %s1087_s17 = sphi %s1141_s17, %s1360_s17   ;;  %s1083_s16 = sphi %s1139_s16, %s1359_s16   ;;  %s1079_s15 = sphi %s1137_s15, %s1358_s15  }
   0x6   : > { %s29_s25 = sadd.s32 1, %s1099_s20  ;;  %s36_s26 = sadd.s32 1, %s1103_s21 }
   0x7   : > { %p30_p0 = scmp.ge.s32.totalorder %s29_s25, 2  ;;  %p161_p1 = scmp.ne.s32.totalorder %s1087_s17, %s1083_s16 }
   0x8   : > { %p162_p2 = scmp.eq.s32.totalorder %s777_s23, 3  ;;  %p167_p5 = scmp.ne.s32.totalorder %s1083_s16, %s1079_s15 }
   0x9   : > { %s1366_s25 = smov (%p30_p0, %s29_s25), 0  ;;  %s1368_s26 = smov (!%p30_p0, %s36_s26), %s1103_s21 }
   0xa   : > { %s145_s27 = ssub.s32 %s1099_s20, %s1366_s25  ;;  %p1188_p3 = por %p162_p2, %p161_p1 }
   0xb   : > { %p38_p4 = scmp.ge.s32.totalorder %s1368_s26, 2  ;;  %p168_p6 = scmp.eq.s32.totalorder %s778_s24, 3 }
   0xc   : > { %p784_p7 = scmp.ge.s32.totalorder %s1107_s22, 1  ;;  %p213_p9 = scmp.lt.s32.totalorder %s1107_s22, 5 }
   0xd   : > { %s1370_s26 = smov (%p38_p4, %s1368_s26), 0  ;;  %p1197_p8 = por %p168_p6, %p167_p5 }
   0xe   : > { %s144_s30 = ssub.s32 %s1103_s21, %s1370_s26  ;;  %s151_s5 = sadd.s32 1, %s1087_s17 }
   0xf   : > { %s146_s6 = sor.u32 %s145_s27, %s144_s30  ;;  %p214_p10 = pnand %p784_p7, %p213_p9 }
  0x10   : > { %p149_p11 = scmp.eq.s32.totalorder %s146_s6, 0  ;;  %v1003_v0 = vld [vmem:[%s1352_s1] sm:$0xff] (!%p214_p10)   ;;  %p249_p12 = scmp.lt.s32.totalorder (!%p214_p10), %s1095_s19, 1  ;;  %v1004_v1 = vld [vmem:[%s1352_s1 + $0x8] sm:$0xff] (!%p214_p10)   ;;  %vm343_vm0 = vcmask (!%p214_p10), 261120  }
  0x11   : > { %217 = sbr.rel (%p214_p10) target bundleno = 284 (0x11c), region = 36  ;;  %s788_s12 = sshll.u32 (!%p214_p10), %s1091_s18, 7  ;;  %906 = vmatprep.subr.bf16.mxu0 (!%p214_p10), %v1003_v0  ;;  %926 = vmatprep.subr.bf16.mxu1 (!%p214_p10), %v1003_v0  ;;  %v1231_v10 = vld [vmem:[%s1353_s2] ss:$0 sm:$0xff] (!%p214_p10) }
  0x12   : > { %s1206_s7 = scalar_select %p149_p11, %s1087_s17, %s151_s5  }
  0x13   : > { %907 = vmatpush3.bf16.msra.mxu0 (!%p214_p10), %v1003_v0  ;;  %928 = vmatpush3.bf16.msra.mxu1 (!%p214_p10), %v1003_v0  ;;  %s267_s14 = sshra.s32 (!%p214_p10), %s788_s12, 3  ;;  %v1236_v12 = vld [vmem:[%s1354_s3] ss:$0 sm:$0xff] (!%p214_p10)  ;;  %s246_s12 = sand.u32 (!%p214_p10), 1, %s1083_s16  }
  0x14   : > { %908 = vmatprep.subr.bf16.mxu0 (!%p214_p10), %v1004_v1  ;;  %927 = vmatprep.subr.bf16.mxu1 (!%p214_p10), %v1004_v1  ;;  %s789_s24 = sshll.u32 (!%p214_p10), %s267_s14, 2  ;;  %s1299_s8 = scalar_lea.sflag (!%p214_p10), [#allocation3], %s246_s12 }
  0x15   : > { %s1109_s10 = smov (!%p214_p10), [#allocation2]  }
  0x16   : > { %s1017_s11 = sshll.u32 (!%p214_p10), %s1109_s10, 4  ;;  %s1018_s11 = int_to_ptr.vmem [resolvable:$false] %s1017_s11 }
  0x17   : > { %909 = vmatpush3.bf16.msra.mxu0 (!%p214_p10), %v1004_v1  ;;  %929 = vmatpush3.bf16.msra.mxu1 (!%p214_p10), %v1004_v1 }
  0x18   : > { %s250_s13 = scalar_select %p249_p12, %s1095_s19, 1 }
  0x1a   : > { %s832_s23 = sshll.u32 %s250_s13, 7  ;;  %s785_s13 = sshll.u32 %s246_s12, 6 }
  0x1b   : > { %s253_s5 = scalar_lea.vmem %s1351_s0, %s832_s23  ;;  %s1262_s14 = scalar_lea.vmem [#allocation2], %s785_s13 }
  0x1c   : > { %s270_s6 = scalar_lea.vmem %s253_s5, %s789_s24  ;;  %s827_s23 = sshll.u32 %s1091_s18, 4 }
  0x1d   : > { %v1005_v2 = vld [vmem:[%s270_s6] sm:$0xff]   ;;  %v1007_v4 = vld [vmem:[%s270_s6 + $0x8] sm:$0xff]   ;;  %v1009_v6 = vld [vmem:[%s270_s6 + $0x10] sm:$0xff]   ;;  %s828_s24 = sshll.u32 %s1095_s19, 5  ;;  %s656_s19 = sshll.u32 %s1262_s14, 4  ;;  %s1293_s19 = int_to_ptr.vmem [resolvable:$true] %s656_s19 }
  0x1e   : > { %v1006_v3 = vld [vmem:[%s270_s6 + $0x20] sm:$0xff]   ;;  %910 = vmatprep.mubr.msk.bf16.mxu0 %vm343_vm0, %v1005_v2  ;;  %v1008_v5 = vld [vmem:[%s270_s6 + $0x28] sm:$0xff]   ;;  %v1010_v7 = vld [vmem:[%s270_s6 + $0x30] sm:$0xff]   ;;  %s653_s27 = sadd.s32 %s828_s24, %s827_s23  ;;  %s1013_s9 = scalar_lea.vmem %s1293_s19, 1024 }
  0x1f   : > { %918 = vmatprep.mubr.msk.bf16.mxu1 %vm343_vm0, %v1006_v3  ;;  %911 = vmatmul.mubr.msk.bf16.vlgmr.msra.gmra.mrb[0].mxu0 %vm343_vm0, %v1007_v4  ;;  %v1011_v8 = vld [vmem:[%s270_s6 + $0x18] sm:$0xff]   ;;  %s829_s18 = sshll.u32 %s653_s27, 6  ;;  %p1014_p13 = scmp.ne.s32.totalorder %s1293_s19, %s1013_s9 }
  0x20   : > { %919 = vmatmul.mubr.msk.bf16.vlgmr.msra.gmra.mrb[0].mxu1 %vm343_vm0, %v1008_v5  ;;  %914 = vmatprep.mubr.msk.bf16.mxu0 %vm343_vm0, %v1009_v6  ;;  %v1012_v9 = vld [vmem:[%s270_s6 + $0x38] sm:$0xff]   ;;  %s1291_s6 = scalar_lea.hbm %s1355_s4, %s829_s18  ;;  %s1019_s13 = scalar_lea.vmem %s1018_s11, 2048 }
  0x21   : > { %922 = vmatprep.mubr.msk.bf16.mxu1 %vm343_vm0, %v1010_v7  ;;  %p1015_p0 = pnand %p1014_p13, %p1188_p3  ;;  %p1020_p2 = scmp.lt.s32.totalorder %s1293_s19, %s1018_s11 }
  0x22   : > { %p1021_p4 = scmp.lt.s32.totalorder %s1019_s13, %s1013_s9 }
  0x23   : > { %p1016_p1 = pneg %p1015_p0 }
  0x24   : > { %p1022_p5 = por %p1021_p4, %p1020_p2 }
  0x26   : > { %p1023_p6 = pnand %p1022_p5, %p1016_p1 }
  0x27   : > { %915 = vmatmul.mubr.msk.bf16.gmra.mrb[4].mxu0 %vm343_vm0, %v1011_v8 }
  0x28   : > { %923 = vmatmul.mubr.msk.bf16.gmra.mrb[4].mxu1 %vm343_vm0, %v1012_v9 }
  0xf2   : > { %v912_v11 = vpop.f32.mrb[0].mxu0 }
  0xf3   : > { %v474_v13 = vmul.f32 %v912_v11, %v1231_v10  ;;  %v920_v14 = vpop.f32.mrb[0].mxu1  ;;  %v402_v15 = vpop.f32.mrb[1].mxu0 }
  0xf4   : > { %v482_v16 = vmul.f32 %v920_v14, %v1231_v10  ;;  %v472_v17 = vmul.f32 %v1231_v10, %v402_v15  ;;  %v434_v18 = vpop.f32.mrb[1].mxu1  ;;  %v913_v19 = vpop.f32.mrb[2].mxu0 }
  0xf5   : > { %v497_v20 = vadd.f32 %v1236_v12, %v474_v13  ;;  %v480_v21 = vmul.f32 %v1231_v10, %v434_v18  ;;  %v475_v22 = vmul.f32 %v913_v19, %v1231_v10  ;;  %v921_v23 = vpop.f32.mrb[2].mxu1  ;;  %v405_v24 = vpop.f32.mrb[3].mxu0 }
  0xf6   : > { %v505_v25 = vadd.f32 %v1236_v12, %v482_v16  ;;  %v495_v26 = vadd.f32 %v1236_v12, %v472_v17  ;;  %v483_v27 = vmul.f32 %v921_v23, %v1231_v10  ;;  %v473_v28 = vmul.f32 %v1231_v10, %v405_v24  ;;  %v437_v29 = vpop.f32.mrb[3].mxu1 }
  0xf7   : > { %vm513_vm1 = vcmp.ge.f32.partialorder %v497_v20, 0.0  ;;  %v529_v30 = vmul.f32 0.1, %v497_v20  ;;  %v503_v31 = vadd.f32 %v1236_v12, %v480_v21  ;;  %v498_v32 = vadd.f32 %v1236_v12, %v475_v22 }
  0xf8   : > { %vm521_vm2 = vcmp.ge.f32.partialorder %v505_v25, 0.0  ;;  %v537_v33 = vmul.f32 0.1, %v505_v25  ;;  %vm511_vm3 = vcmp.ge.f32.partialorder %v495_v26, 0.0  ;;  %v527_v34 = vmul.f32 0.1, %v495_v26 }
  0xf9   : > { %v545_v35 = vsel %vm513_vm1, %v497_v20, %v529_v30  ;;  %vm519_vm4 = vcmp.ge.f32.partialorder %v503_v31, 0.0  ;;  %vm514_vm5 = vcmp.ge.f32.partialorder %v498_v32, 0.0  ;;  %v535_v37 = vmul.f32 0.1, %v503_v31 }
  0xfa   : > { %v553_v36 = vsel %vm521_vm2, %v505_v25, %v537_v33  ;;  %v530_v38 = vmul.f32 0.1, %v498_v32  ;;  %v506_v39 = vadd.f32 %v1236_v12, %v483_v27  ;;  %v916_v40 = vpop.f32.mrb[4].mxu0  ;;  %v543_v41 = vsel %vm511_vm3, %v495_v26, %v527_v34 }
  0xfb   : > { %v496_v42 = vadd.f32 %v1236_v12, %v473_v28  ;;  %v481_v43 = vmul.f32 %v1231_v10, %v437_v29  ;;  %v478_v44 = vmul.f32 %v916_v40, %v1231_v10  ;;  %v924_v45 = vpop.f32.mrb[4].mxu1  ;;  %v418_v46 = vpop.f32.mrb[5].mxu0  ;;  %v551_v1 = vsel %vm519_vm4, %v503_v31, %v535_v37 }
  0xfc   : > { %v546_v47 = vsel %vm514_vm5, %v498_v32, %v530_v38  ;;  %vm522_vm6 = vcmp.ge.f32.partialorder %v506_v39, 0.0  ;;  %v538_v48 = vmul.f32 0.1, %v506_v39  ;;  %v486_v49 = vmul.f32 %v924_v45, %v1231_v10  ;;  %v450_v50 = vpop.f32.mrb[5].mxu1  ;;  %v917_v51 = vpop.f32.mrb[6].mxu0 }
  0xfd   : > { %v857_v52 = vpack.c.bf16 %v546_v47, %v545_v35  ;;  %vm512_vm7 = vcmp.ge.f32.partialorder %v496_v42, 0.0  ;;  %v528_v53 = vmul.f32 0.1, %v496_v42  ;;  %v504_v54 = vadd.f32 %v1236_v12, %v481_v43  ;;  %v925_v55 = vpop.f32.mrb[6].mxu1  ;;  %v421_v56 = vpop.f32.mrb[7].mxu0 }
  0xfe   : > { %v554_v57 = vsel %vm522_vm6, %v506_v39, %v538_v48  ;;  %v501_v58 = vadd.f32 %v1236_v12, %v478_v44  ;;  %v509_v59 = vadd.f32 %v1236_v12, %v486_v49  ;;  %v476_v60 = vmul.f32 %v1231_v10, %v418_v46  ;;  %v453_v61 = vpop.f32.mrb[7].mxu1 }
  0xff   : > { %889 = vst [vmem:[%s1262_s14 + $0x8] sm:$0xff] %v857_v52   ;;  %v877_v62 = vpack.c.bf16 %v554_v57, %v553_v36  ;;  %v544_v63 = vsel %vm512_vm7, %v496_v42, %v528_v53  ;;  %vm520_vm8 = vcmp.ge.f32.partialorder %v504_v54, 0.0  ;;  %v536_v0 = vmul.f32 0.1, %v504_v54 }
 0x100   : > { %v852_v2 = vpack.c.bf16 %v544_v63, %v543_v41  ;;  %vm517_vm9 = vcmp.ge.f32.partialorder %v501_v58, 0.0  ;;  %v533_v4 = vmul.f32 0.1, %v501_v58  ;;  %v541_v5 = vmul.f32 0.1, %v509_v59 }
 0x101   : > { %893 = vst [vmem:[%s1262_s14 + $0x28] sm:$0xff] %v877_v62   ;;  %v552_v3 = vsel %vm520_vm8, %v504_v54, %v536_v0  ;;  %v484_v6 = vmul.f32 %v1231_v10, %v450_v50  ;;  %vm525_vm10 = vcmp.ge.f32.partialorder %v509_v59, 0.0  ;;  %v479_v8 = vmul.f32 %v917_v51, %v1231_v10 }
 0x102   : > { %853 = vst [vmem:[%s1262_s14] sm:$0xff] %v852_v2   ;;  %v872_v7 = vpack.c.bf16 %v552_v3, %v551_v1  ;;  %v487_v9 = vmul.f32 %v925_v55, %v1231_v10  ;;  %v499_v11 = vadd.f32 %v1236_v12, %v476_v60  ;;  %v477_v16 = vmul.f32 %v1231_v10, %v421_v56 }
 0x103   : > { %v507_v13 = vadd.f32 %v1236_v12, %v484_v6  ;;  %v502_v14 = vadd.f32 %v1236_v12, %v479_v8  ;;  %v485_v17 = vmul.f32 %v1231_v10, %v453_v61  ;;  %v549_v18 = vsel %vm517_vm9, %v501_v58, %v533_v4 }
 0x104   : > { %892 = vst [vmem:[%s1262_s14 + $0x20] sm:$0xff] %v872_v7   ;;  %v510_v15 = vadd.f32 %v1236_v12, %v487_v9  ;;  %v557_v19 = vsel %vm525_vm10, %v509_v59, %v541_v5  ;;  %vm515_vm13 = vcmp.ge.f32.partialorder %v499_v11, 0.0  ;;  %v531_v22 = vmul.f32 0.1, %v499_v11 }
 0x105   : > { %vm518_vm11 = vcmp.ge.f32.partialorder %v502_v14, 0.0  ;;  %v534_v20 = vmul.f32 0.1, %v502_v14  ;;  %v500_v23 = vadd.f32 %v1236_v12, %v477_v16  ;;  %v508_v24 = vadd.f32 %v1236_v12, %v485_v17 }
 0x106   : > { %vm526_vm12 = vcmp.ge.f32.partialorder %v510_v15, 0.0  ;;  %v542_v21 = vmul.f32 0.1, %v510_v15  ;;  %vm523_vm14 = vcmp.ge.f32.partialorder %v507_v13, 0.0  ;;  %v539_v25 = vmul.f32 0.1, %v507_v13 }
 0x107   : > { %v550_v10 = vsel %vm518_vm11, %v502_v14, %v534_v20  ;;  %vm516_vm15 = vcmp.ge.f32.partialorder %v500_v23, 0.0  ;;  %v532_v29 = vmul.f32 0.1, %v500_v23  ;;  %vm524_vm0 = vcmp.ge.f32.partialorder %v508_v24, 0.0 }
 0x108   : > { %v558_v26 = vsel %vm526_vm12, %v510_v15, %v542_v21  ;;  %v867_v27 = vpack.c.bf16 %v550_v10, %v549_v18  ;;  %v540_v30 = vmul.f32 0.1, %v508_v24  ;;  %v547_v31 = vsel %vm515_vm13, %v499_v11, %v531_v22 }
 0x109   : > { %v887_v28 = vpack.c.bf16 %v558_v26, %v557_v19  ;;  %v548_v12 = vsel %vm516_vm15, %v500_v23, %v532_v29  ;;  %v555_v32 = vsel %vm523_vm14, %v507_v13, %v539_v25 }
 0x10a   : > { %891 = vst [vmem:[%s1262_s14 + $0x18] sm:$0xff] %v867_v27   ;;  %v862_v33 = vpack.c.bf16 %v548_v12, %v547_v31  ;;  %v556_v34 = vsel %vm524_vm0, %v508_v24, %v540_v30 }
 0x10b   : > { %895 = vst [vmem:[%s1262_s14 + $0x38] sm:$0xff] %v887_v28   ;;  %v882_v35 = vpack.c.bf16 %v556_v34, %v555_v32 }
 0x10c   : > { %890 = vst [vmem:[%s1262_s14 + $0x10] sm:$0xff] %v862_v33  }
 0x10d   : > { %894 = vst [vmem:[%s1262_s14 + $0x30] sm:$0xff] %v882_v35  }
 0x10e   : > { %1026 = shalt.err (!%p1023_p6)
}
 0x10f   : > { %s1027_s12 = scalar_lea.hbm %s1291_s6, 1024  ;;  %s1031_s24 = scalar_lea.hbm %s1355_s4, 4096 }
 0x110   : > { %p1028_p7 = scmp.ne.s32.totalorder %s1291_s6, %s1027_s12  ;;  %p1032_p11 = scmp.lt.u32.totalorder %s1291_s6, %s1355_s4 }
 0x111   : > { %p1033_p12 = scmp.lt.u32.totalorder %s1031_s24, %s1027_s12  ;;  %p1035_p0 = scmp.lt.u32.totalorder %s1027_s12, %s1291_s6 }
 0x112   : > { %p1029_p9 = pnand %p1028_p7, %p1188_p3 }
 0x113   : > { %p1034_p13 = por %p1033_p12, %p1032_p11 }
 0x114   : > { %p1030_p10 = pneg %p1029_p9 }
 0x115   : > { %p1036_p1 = por %p1035_p0, %p1034_p13 }
 0x117   : > { %p1037_p2 = pnand %p1036_p1, %p1030_p10 }
 0x119   : > { %1040 = shalt.err (!%p1037_p2)
}
 0x11a   : > { %s1110_s30 = smov 64   ;;  %s1111_s5 = smov 4  }
 0x11b   : > { %930 = dma.vmem_to_hbm [thread:$0]  (%p1188_p3), %s1293_s19, 1024, %s1291_s6, %s1299_s8, %s1110_s30, %s1110_s30, %s1111_s5  }
 0x11c PF: > { %p936_p4 = scmp.ge.s32.totalorder %s1107_s22, 2  ;;  %s671_s9 = sand.u32 1, %s1079_s15  }
 0x11d   : > { %s672_s10 = scalar_lea.sflag [#allocation3], %s671_s9 }
 0x11e   : > { %p933_p5 = pnand %p936_p4, %p1197_p8 }
 0x120   : > { %1074 = dma.done.wait (!%p933_p5), %s672_s10, 1024  }
 0x121   : > { %1076 = vsyncadd (!%p933_p5), %s672_s10, 4294966272  ;;  %s17_s22 = sadd.s32 1, %s1107_s22   ;;  %s1358_s15 = smov %s1083_s16 }
 0x122   : > { %p14_p6 = scmp.ge.s32.totalorder %s17_s22, 6   ;;  %s1359_s16 = smov %s1087_s17 }
 0x123   : > { %s1360_s17 = smov %s1206_s7  ;;  %s1361_s18 = smov %s1099_s20 }
 0x124   : > { %s1362_s19 = smov %s1103_s21  ;;  %s1363_s20 = smov %s1366_s25 }
 0x125   : > { %s1364_s21 = smov %s1370_s26  ;;  %16 = sbr.rel (!%p14_p6) target bundleno = 5 (0x5), region = 81 }
 0x12c   :  { %677 = vsyncpa [#allocation3], 1 }
 0x12d   :  { %679 = vsyncpa [#allocation3 + $0x1], 1 }

</bundles_post_ra>
